<compile_context>
chip_gen: v6e
topology: v6e:2x2x1
jax: 0.10.0
libtpu: 0.0.40
codegen_flags: <defaults>
</compile_context>

<pallas_src>
import functools

import jax
import jax.numpy as jnp
import numpy as np
from jax.experimental import pallas as pl
from jax.experimental.pallas import tpu as pltpu


def _sdpa_kernel(inv_temperature,
                 q_ref, kt_ref, v_ref,
                 out_ref, attn_ref, log_attn_ref):
    # Blocks:
    #   q : (B_blk, Lq_blk, Dk)    kt: (B_blk, Dk, Lk)    v: (B_blk, Lk, Dv)
    # Fold the temperature scale into q (smallest tensor it can be applied to).
    q = q_ref[...] * inv_temperature
    kt = kt_ref[...]
    v = v_ref[...]

    # scores = (q / T) @ k^T  -- batched MXU matmul, f32 accumulation, no
    # in-kernel transpose since k arrives as (B, Dk, Lk).
    scores = jnp.einsum("bqd,bdk->bqk", q, kt,
                        preferred_element_type=jnp.float32)

    # Numerically-stable softmax / log_softmax over the key axis.
    m = jnp.max(scores, axis=-1, keepdims=True)
    shifted = scores - m
    e = jnp.exp(shifted)
    denom = jnp.sum(e, axis=-1, keepdims=True)
    # Exact reciprocal: denom is only (B_blk, Lq_blk, 1), so this costs almost
    # nothing and keeps attn rows summing to 1 to f32 precision (the approx
    # EUP reciprocal previously blew the 1e-3 tolerance).
    inv_denom = 1.0 / denom
    attn = e * inv_denom
    log_attn = shifted - jnp.log(denom)

    # TODO(synk): attention dropout is identity here (eval mode); no RNG /
    # dropout mask is applied before the PV matmul.
    out = jnp.einsum("bqk,bkd->bqd", attn.astype(v.dtype), v,
                     preferred_element_type=jnp.float32)

    out_ref[...] = out.astype(out_ref.dtype)
    attn_ref[...] = attn.astype(attn_ref.dtype)
    log_attn_ref[...] = log_attn.astype(log_attn_ref.dtype)


def _vmem_limit_bytes():
    """Generation-aware scoped-VMEM limit (v7x has only 64 MiB per TC)."""
    try:
        cap = int(getattr(pltpu.get_tpu_info(), "vmem_capacity_bytes",
                          64 * 1024 * 1024))
    except Exception:
        cap = 64 * 1024 * 1024
    return int(min(max(cap // 2, 32 * 1024 * 1024), 64 * 1024 * 1024))


def _default_blocks(B, Lq, Lk, Dk, Dv, itemsize, vmem_limit):
    """Pick (batch_block, lq_block) that fit VMEM with double-buffering."""
    # Lq tile: full when small, otherwise 256 rows (multiple of the 8-sublane
    # tile). Lk stays whole so the softmax is single-pass.
    lq_block = Lq if Lq <= 256 else 256

    # Per batch element per grid step:
    #  * input blocks (q tile, full k^T, full v) and output blocks (out /
    #    attn / log_attn tiles) are each double-buffered by the pipeline (x2),
    #  * plus ~5 live f32 slabs of (lq_block, Lk) softmax intermediates
    #    (scores / shifted / e / attn / log_attn) and the f32 out accumulator.
    io_bytes = itemsize * (lq_block * Dk + Dk * Lk + Lk * Dv
                           + lq_block * Dv + 2 * lq_block * Lk)
    live_bytes = 4 * (5 * lq_block * Lk + lq_block * Dv)
    per_b = 2 * io_bytes + live_bytes

    budget = vmem_limit // 2                      # headroom for the compiler
    batch_block = max(1, min(B, budget // max(per_b, 1)))

    # Prefer >= ~8 grid steps (when there is enough work) so writeback of the
    # big attn/log_attn outputs overlaps the next block's compute and the
    # "parallel" axes shard across TensorCores on multi-core parts.
    min_steps = 8
    lq_steps = -(-Lq // lq_block)
    if lq_steps * (-(-B // batch_block)) < min_steps and B > 1:
        want_b_steps = min(B, max(1, -(-min_steps // lq_steps)))
        batch_block = min(batch_block, max(1, -(-B // want_b_steps)))
    return batch_block, lq_block


def scaled_dot_product_attention(q, k, v, temperature, *,
                                 batch_block=None, lq_block=None):
    """q: (B, Lq, Dk), k: (B, Lk, Dk), v: (B, Lk, Dv) -> (output, attn, log_attn)."""
    B, Lq, Dk = q.shape
    Bk, Lk, Dk2 = k.shape
    Bv, Lv, Dv = v.shape
    assert B == Bk == Bv, "batch dims of q/k/v must match"
    assert Dk == Dk2, "q and k feature dims must match"
    assert Lv == Lk, "attn @ v requires len_v == len_k"

    vmem_limit = _vmem_limit_bytes()
    auto_bb, auto_lqb = _default_blocks(B, Lq, Lk, Dk, Dv,
                                        jnp.dtype(q.dtype).itemsize, vmem_limit)
    if batch_block is None:
        batch_block = auto_bb
    if lq_block is None:
        lq_block = auto_lqb

    # Wrapper-side layout plumbing: present k as (B, Dk, Lk) so the kernel's
    # QK^T contraction needs no in-kernel transpose.
    kt = jnp.swapaxes(k, 1, 2)

    grid = (pl.cdiv(B, batch_block), pl.cdiv(Lq, lq_block))
    # NOTE: 1/temperature is baked in as a compile-time constant; a runtime-
    # varying temperature would retrace (pass it as an SMEM scalar if needed).
    kernel = functools.partial(_sdpa_kernel, float(1.0 / temperature))

    out_dtype = q.dtype
    out_shapes = (
        jax.ShapeDtypeStruct((B, Lq, Dv), out_dtype),   # output
        jax.ShapeDtypeStruct((B, Lq, Lk), out_dtype),   # attn (post-softmax)
        jax.ShapeDtypeStruct((B, Lq, Lk), out_dtype),   # log_attn
    )

    return pl.pallas_call(
        kernel,
        out_shape=out_shapes,
        grid_spec=pltpu.PrefetchScalarGridSpec(
            num_scalar_prefetch=0,
            grid=grid,
            in_specs=[
                pl.BlockSpec((batch_block, lq_block, Dk), lambda b, i: (b, i, 0)),
                pl.BlockSpec((batch_block, Dk, Lk), lambda b, i: (b, 0, 0)),
                pl.BlockSpec((batch_block, Lk, Dv), lambda b, i: (b, 0, 0)),
            ],
            out_specs=(
                pl.BlockSpec((batch_block, lq_block, Dv), lambda b, i: (b, i, 0)),
                pl.BlockSpec((batch_block, lq_block, Lk), lambda b, i: (b, i, 0)),
                pl.BlockSpec((batch_block, lq_block, Lk), lambda b, i: (b, i, 0)),
            ),
        ),
        compiler_params=pltpu.CompilerParams(
            dimension_semantics=("parallel", "parallel"),
            vmem_limit_bytes=vmem_limit,
        ),
    )(q, kt, v)


if __name__ == "__main__":
    # Small shapes consistent with the module's forward (eval mode).
    B, Lq, Lk = 2, 8, 8
    Dk, Dv = 16, 32
    temperature = float(np.sqrt(Dk))

    key = jax.random.PRNGKey(0)
    kq, kk, kv = jax.random.split(key, 3)
    q = jax.random.normal(kq, (B, Lq, Dk), jnp.float32)
    k = jax.random.normal(kk, (B, Lk, Dk), jnp.float32)
    v = jax.random.normal(kv, (B, Lk, Dv), jnp.float32)

    out, attn, log_attn = scaled_dot_product_attention(q, k, v, temperature)
    out, attn, log_attn = jax.block_until_ready((out, attn, log_attn))

    # Pure-JAX reference of the PyTorch forward (dropout = identity).
    ref_scores = jnp.einsum("bqd,bkd->bqk", q, k) / temperature
    ref_attn = jax.nn.softmax(ref_scores, axis=-1)
    ref_log_attn = jax.nn.log_softmax(ref_scores, axis=-1)
    ref_out = jnp.einsum("bqk,bkd->bqd", ref_attn, v)

    np.testing.assert_allclose(np.asarray(out), np.asarray(ref_out), atol=1e-3, rtol=1e-3)
    np.testing.assert_allclose(np.asarray(attn), np.asarray(ref_attn), atol=1e-3, rtol=1e-3)
    np.testing.assert_allclose(np.asarray(log_attn), np.asarray(ref_log_attn), atol=1e-3, rtol=1e-3)

    print("KERNEL_OK")
</pallas_src>

<mosaic_0001>
module attributes {stable_mosaic.version = 11 : i64} {
  func.func @_sdpa_kernel(%arg0: i32, %arg1: i32, %arg2: memref<1x8x16xf32, #tpu.memory_space<vmem>>, %arg3: memref<1x16x8xf32, #tpu.memory_space<vmem>>, %arg4: memref<1x8x32xf32, #tpu.memory_space<vmem>>, %arg5: memref<1x8x32xf32, #tpu.memory_space<vmem>>, %arg6: memref<1x8x8xf32, #tpu.memory_space<vmem>>, %arg7: memref<1x8x8xf32, #tpu.memory_space<vmem>>) attributes {dimension_semantics = [#tpu.dimension_semantics<parallel>, #tpu.dimension_semantics<parallel>], iteration_bounds = array<i64: 2, 1>, scalar_prefetch = 0 : i64, scratch_operands = 0 : i64, tpu.core_type = #tpu.core_type<tc>, window_params = [{transform_indices = @transform_0, window_bounds = array<i64: 1, 8, 16>}, {transform_indices = @transform_1, window_bounds = array<i64: 1, 16, 8>}, {transform_indices = @transform_2, window_bounds = array<i64: 1, 8, 32>}, {transform_indices = @transform_3, window_bounds = array<i64: 1, 8, 32>}, {transform_indices = @transform_4, window_bounds = array<i64: 1, 8, 8>}, {transform_indices = @transform_5, window_bounds = array<i64: 1, 8, 8>}]} {
    %c0 = arith.constant 0 : index
    %c0_0 = arith.constant 0 : index
    %c0_1 = arith.constant 0 : index
    %0 = vector.load %arg2[%c0, %c0_0, %c0_1] : memref<1x8x16xf32, #tpu.memory_space<vmem>>, vector<1x8x16xf32>
    %cst = arith.constant 2.500000e-01 : f32
    %1 = vector.broadcast %cst : f32 to vector<1x8x16xf32>
    %2 = arith.mulf %0, %1 : vector<1x8x16xf32>
    %c0_2 = arith.constant 0 : index
    %c0_3 = arith.constant 0 : index
    %c0_4 = arith.constant 0 : index
    %3 = vector.load %arg3[%c0_2, %c0_3, %c0_4] : memref<1x16x8xf32, #tpu.memory_space<vmem>>, vector<1x16x8xf32>
    %c0_5 = arith.constant 0 : index
    %c0_6 = arith.constant 0 : index
    %c0_7 = arith.constant 0 : index
    %4 = vector.load %arg4[%c0_5, %c0_6, %c0_7] : memref<1x8x32xf32, #tpu.memory_space<vmem>>, vector<1x8x32xf32>
    "tpu.trace_start"() <{level = 10 : i32, message = "bqd,bdk->bqk"}> : () -> ()
    %cst_8 = arith.constant dense<0.000000e+00> : vector<1x8x8xf32>
    %5 = tpu.matmul %2, %3, %cst_8 {dimension_numbers = #tpu.dot_dimension_numbers<[2], [1], [1], [2], [0, 0, 0, 1, 1, 2], [0], [0]>} : vector<1x8x16xf32>, vector<1x16x8xf32>, vector<1x8x8xf32> -> vector<1x8x8xf32>
    "tpu.trace_stop"() : () -> ()
    %cst_9 = arith.constant dense<0xFF800000> : vector<1x8xf32>
    %6 = vector.multi_reduction <maximumf>, %5, %cst_9 [2] : vector<1x8x8xf32> to vector<1x8xf32>
    %7 = vector.shape_cast %6 : vector<1x8xf32> to vector<1x8x1xf32>
    %8 = vector.broadcast %7 : vector<1x8x1xf32> to vector<1x8x8xf32>
    %9 = arith.subf %5, %8 : vector<1x8x8xf32>
    %10 = math.exp %9 : vector<1x8x8xf32>
    %cst_10 = arith.constant dense<0.000000e+00> : vector<1x8xf32>
    %11 = vector.multi_reduction <add>, %10, %cst_10 [2] : vector<1x8x8xf32> to vector<1x8xf32>
    %12 = vector.shape_cast %11 : vector<1x8xf32> to vector<1x8x1xf32>
    %cst_11 = arith.constant 1.000000e+00 : f32
    %13 = vector.broadcast %cst_11 : f32 to vector<1x8x1xf32>
    %14 = arith.divf %13, %12 : vector<1x8x1xf32>
    %15 = vector.broadcast %14 : vector<1x8x1xf32> to vector<1x8x8xf32>
    %16 = arith.mulf %10, %15 : vector<1x8x8xf32>
    %17 = math.log %12 : vector<1x8x1xf32>
    %18 = vector.broadcast %17 : vector<1x8x1xf32> to vector<1x8x8xf32>
    %19 = arith.subf %9, %18 : vector<1x8x8xf32>
    "tpu.trace_start"() <{level = 10 : i32, message = "bqk,bkd->bqd"}> : () -> ()
    %cst_12 = arith.constant dense<0.000000e+00> : vector<1x8x32xf32>
    %20 = tpu.matmul %16, %4, %cst_12 {dimension_numbers = #tpu.dot_dimension_numbers<[2], [1], [1], [2], [0, 0, 0, 1, 1, 2], [0], [0]>} : vector<1x8x8xf32>, vector<1x8x32xf32>, vector<1x8x32xf32> -> vector<1x8x32xf32>
    "tpu.trace_stop"() : () -> ()
    %c0_13 = arith.constant 0 : index
    %c0_14 = arith.constant 0 : index
    %c0_15 = arith.constant 0 : index
    %21 = vector.load %arg5[%c0_13, %c0_14, %c0_15] : memref<1x8x32xf32, #tpu.memory_space<vmem>>, vector<1x8x32xf32>
    tpu.vector_store %arg5[%c0_13, %c0_14, %c0_15], %20 {strides = array<i32>} : memref<1x8x32xf32, #tpu.memory_space<vmem>>, vector<1x8x32xf32>,
    %c0_16 = arith.constant 0 : index
    %c0_17 = arith.constant 0 : index
    %c0_18 = arith.constant 0 : index
    %22 = vector.load %arg6[%c0_16, %c0_17, %c0_18] : memref<1x8x8xf32, #tpu.memory_space<vmem>>, vector<1x8x8xf32>
    tpu.vector_store %arg6[%c0_16, %c0_17, %c0_18], %16 {strides = array<i32>} : memref<1x8x8xf32, #tpu.memory_space<vmem>>, vector<1x8x8xf32>,
    %c0_19 = arith.constant 0 : index
    %c0_20 = arith.constant 0 : index
    %c0_21 = arith.constant 0 : index
    %23 = vector.load %arg7[%c0_19, %c0_20, %c0_21] : memref<1x8x8xf32, #tpu.memory_space<vmem>>, vector<1x8x8xf32>
    tpu.vector_store %arg7[%c0_19, %c0_20, %c0_21], %19 {strides = array<i32>} : memref<1x8x8xf32, #tpu.memory_space<vmem>>, vector<1x8x8xf32>,
    return
  }
  func.func @transform_0(%arg0: i32, %arg1: i32) -> (i32, i32, i32) {
    %c0_i32 = arith.constant 0 : i32
    %c0_i32_0 = arith.constant 0 : i32
    return %arg0, %arg1, %c0_i32 : i32, i32, i32
  }
  func.func @transform_1(%arg0: i32, %arg1: i32) -> (i32, i32, i32) {
    %c0_i32 = arith.constant 0 : i32
    %c0_i32_0 = arith.constant 0 : i32
    %c0_i32_1 = arith.constant 0 : i32
    return %arg0, %c0_i32, %c0_i32_0 : i32, i32, i32
  }
  func.func @transform_2(%arg0: i32, %arg1: i32) -> (i32, i32, i32) {
    %c0_i32 = arith.constant 0 : i32
    %c0_i32_0 = arith.constant 0 : i32
    %c0_i32_1 = arith.constant 0 : i32
    return %arg0, %c0_i32, %c0_i32_0 : i32, i32, i32
  }
  func.func @transform_3(%arg0: i32, %arg1: i32) -> (i32, i32, i32) {
    %c0_i32 = arith.constant 0 : i32
    %c0_i32_0 = arith.constant 0 : i32
    return %arg0, %arg1, %c0_i32 : i32, i32, i32
  }
  func.func @transform_4(%arg0: i32, %arg1: i32) -> (i32, i32, i32) {
    %c0_i32 = arith.constant 0 : i32
    %c0_i32_0 = arith.constant 0 : i32
    return %arg0, %arg1, %c0_i32 : i32, i32, i32
  }
  func.func @transform_5(%arg0: i32, %arg1: i32) -> (i32, i32, i32) {
    %c0_i32 = arith.constant 0 : i32
    %c0_i32_0 = arith.constant 0 : i32
    return %arg0, %arg1, %c0_i32 : i32, i32, i32
  }
}

</mosaic_0001>

<bundles_post_ra>
// kernel: tpu_custom_call.1
= control target key start
LH: loop header
LB: loop body
LE: loop exit
PB: predicated region body
PF: predicated region fallthrough
CT: control target
= control target key end

     0   :  { %11 = vsyncpa [#allocation3], 0  ;;  %s1158_s0 = inlined_call_operand.vmem [shape: f32[2,8,16], index: 0, kind: input, shape index: {}]   ;;  %s1159_s1 = inlined_call_operand.vmem [shape: f32[2,16,8], index: 1, kind: input, shape index: {}]   ;;  %s1160_s2 = inlined_call_operand.vmem [shape: f32[2,8,32], index: 2, kind: input, shape index: {}]   ;;  %s1161_s3 = inlined_call_operand.hbm [shape: f32[2,8,32], index: 3, kind: output, shape index: {0}]   ;;  %s1162_s4 = inlined_call_operand.hbm [shape: f32[2,8,8], index: 4, kind: output, shape index: {1}]   ;;  %s1163_s5 = inlined_call_operand.hbm [shape: f32[2,8,8], index: 5, kind: output, shape index: {2}]  }
   0x1   :  { %13 = vsyncpa [#allocation3 + $0x1], 0 }
   0x2   :  { %14 = vsyncpa [#allocation5], 0 }
   0x3   :  { %16 = vsyncpa [#allocation5 + $0x1], 0  ;;  %s969_s18 = smov 0   ;;  %s971_s19 = smov 0  }
   0x4   :  { %s973_s20 = smov 0   ;;  %s975_s21 = smov 0  }
   0x5   :  { %s977_s22 = smov 0   ;;  %s979_s23 = smov 0  }
   0x6 LB: > { %s687_s24 = sadd.s32 4294967295, %s932_s23   ;;  %s1164_s25 = sadd.s32 4294967294, %s932_s23   ;;  %s932_s23 = sphi %s979_s23, %s22_s23   ;;  %s928_s22 = sphi %s977_s22, %s1176_s22   ;;  %s924_s21 = sphi %s975_s21, %s1175_s21   ;;  %s920_s20 = sphi %s973_s20, %s1174_s20   ;;  %s916_s19 = sphi %s971_s19, %s1173_s19   ;;  %s912_s18 = sphi %s969_s18, %s1172_s18  }
   0x7   : > { %s34_s26 = sadd.s32 1, %s928_s22  ;;  %s123_s27 = sadd.s32 1, %s920_s20 }
   0x8   : > { %p36_p0 = scmp.ge.s32.totalorder %s34_s26, 2  ;;  %p133_p1 = scmp.ne.s32.totalorder %s920_s20, %s916_s19 }
   0x9   : > { %p134_p2 = scmp.eq.s32.totalorder %s687_s24, 1  ;;  %p139_p3 = scmp.ne.s32.totalorder %s916_s19, %s912_s18 }
   0xa   : > { %s1178_s26 = smov (%p36_p0, %s34_s26), 0  ;;  %p140_p5 = scmp.eq.s32.totalorder %s1164_s25, 1 }
   0xb   : > { %p1011_p4 = por %p134_p2, %p133_p1  ;;  %s118_s29 = ssub.s32 %s928_s22, %s1178_s26 }
   0xc   : > { %p691_p6 = scmp.ge.s32.totalorder %s932_s23, 1  ;;  %p121_p7 = scmp.eq.s32.totalorder %s118_s29, 0 }
   0xd   : > { %p1020_p8 = por %p140_p5, %p139_p3  ;;  %p239_p9 = scmp.lt.s32.totalorder %s932_s23, 3 }
   0xe   : > { %s1026_s6 = scalar_select %p121_p7, %s920_s20, %s123_s27  }
   0xf   : > { %p240_p10 = pnand %p691_p6, %p239_p9 }
  0x10   : > { %p288_p11 = scmp.lt.s32.totalorder (!%p240_p10), %s924_s21, 1  ;;  %s1165_s29 = sand.u32 (!%p240_p10), 1, %s916_s19  }
  0x11   : > { %243 = sbr.rel (%p240_p10) target bundleno = 742 (0x2e6), region = 32  ;;  %s1059_s10 = sand.u32 (!%p240_p10), 1, %s687_s24  }
  0x12   : > { %s1062_s11 = sshll.u32 (!%p240_p10), %s924_s21, 7  ;;  %s482_s16 = scalar_lea.sflag (!%p240_p10), [#allocation5], %s1059_s10 }
  0x13   : > { %s513_s14 = scalar_lea.hbm (!%p240_p10), %s1162_s4, %s1062_s11 }
  0x16   : > { %v934_v0 = vmov 0.0   ;;  %vm935_vm0 = vmmov 0   ;;  %s1030_s7 = scalar_select %p288_p11, %s924_s21, 1  ;;  %vm309_vm1 = vcmask 130048   ;;  %vm383_vm2 = vcmask 64512  }
  0x17   : > { %715 = vmatprep.subr.mxu0 %v934_v0  ;;  %719 = vmatprep.mubr.msk.f32.mxu0 %vm935_vm0, %v934_v0 }
  0x18   : > { %722 = vmatprep.subr.mxu1 %v934_v0  ;;  %724 = vmatprep.mubr.msk.f32.mxu1 %vm935_vm0, %v934_v0  ;;  %s695_s8 = sshll.u32 %s1030_s7, 3  ;;  %s709_s9 = sshll.u32 %s1030_s7, 4 }
  0x19   : > { %s294_s12 = scalar_lea.vmem %s1158_s0, %s695_s8  ;;  %s299_s15 = scalar_lea.vmem %s1159_s1, %s709_s9 }
  0x1a   : > { %v304_v1 = vld [vmem:[%s294_s12] sm:$0xff]  ;;  %v307_v2 = vld [vmem:[%s299_s15 + $0x8] sm:$0xff]  ;;  %s303_s27 = scalar_lea.vmem %s1160_s2, %s695_s8  ;;  %s1048_s7 = sshll.u32 %s1165_s29, 3 }
  0x1b   : > { %v306_v3 = vld [vmem:[%s299_s15] sm:$0xff]  ;;  %v305_v4 = vmul.f32 0.25, %v304_v1  ;;  %716 = vmatpush3.msra.mxu0 %v307_v2  ;;  %s280_s8 = scalar_lea.vmem [#allocation4], %s1048_s7  ;;  %s1166_s9 = scalar_lea.vmem [#allocation6], %s1048_s7 }
  0x1c   : > { %717 = vmatprep.subr.mxu0 %v934_v0  ;;  %v308_v13 = vld [vmem:[%s303_s27] sm:$0xff]  ;;  %s515_s15 = sshll.u32 %s280_s8, 4  ;;  %s936_s27 = smov [#allocation4]   ;;  %s516_s15 = int_to_ptr.vmem [resolvable:$true] %s515_s15 }
  0x1d   : > { %718 = vmatpush3.msra.mxu0 %v306_v3  ;;  %723 = vmatpush3.msra.mxu1 %v308_v13  ;;  %s800_s17 = scalar_lea.vmem %s516_s15, 128  ;;  %s804_s25 = sshll.u32 %s936_s27, 4  ;;  %s805_s25 = int_to_ptr.vmem [resolvable:$false] %s804_s25 }
  0x1e   : > { %720 = vmatmul.mubr.msk.f32.vlgmr.msra.gmra.mxu0 %vm309_vm1, %v305_v4  ;;  %p801_p12 = scmp.ne.s32.totalorder %s516_s15, %s800_s17  ;;  %s806_s24 = scalar_lea.vmem %s805_s25, 256 }
  0x1f   : > { %p807_p1 = scmp.lt.s32.totalorder %s516_s15, %s805_s25  ;;  %p808_p2 = scmp.lt.s32.totalorder %s806_s24, %s800_s17 }
  0x20   : > { %p802_p13 = pnand %p801_p12, %p1011_p4 }
  0x21   : > { %p809_p3 = por %p808_p2, %p807_p1 }
  0x22   : > { %p803_p0 = pneg %p802_p13 }
  0x24   : > { %p810_p5 = pnand %p809_p3, %p803_p0 }
  0xde   : > { %v379_v5 = vpop.f32.mrf.mxu0 }
  0xdf   : > { %v384_v6 = vsel %vm383_vm2, %v379_v5, -inf }
  0xe0   : > { %385 = vmax.xlane.f32.xlu0 %v384_v6  ;;  %v721_v7 = vpop.f32.mrf.mxu0 }
 0x169   : > { %v386_v8 = vpop.xlane.xlu0 %385 }
 0x16a   : > { %v387_v9 = vsub.f32 %v379_v5, %v386_v8 }
 0x16c   : > { %v388_v10 = vmul.f32 1.442695, %v387_v9 }
 0x16e   : > { %794 = vpow2.f32 %v388_v10 }
 0x17b   : > { %v795_v11 = vpop.eup %794 }
 0x17c   : > { %v390_v12 = vsel %vm383_vm2, %v795_v11, 0.0 }
 0x17d   : > { %391 = vadd.xlane.f32.xlu0 %v390_v12 }
 0x206   : > { %v392_v14 = vpop.xlane.xlu0 %391 }
 0x207   : > { %796 = vrcp.f32 %v392_v14 }
 0x208   : > { %798 = vlog2.f32 %v392_v14 }
 0x214   : > { %v797_v15 = vpop.eup %796 }
 0x215   : > { %v799_v16 = vpop.eup %798  ;;  %v395_v17 = vmul.f32 %v797_v15, %v795_v11 }
 0x216   : > { %v397_v18 = vmul.f32 0.6931472, %v799_v16 }
 0x217   : > { %725 = vmatmul.mubr.msk.f32.vlgmr.msra.gmra.mxu1 %vm383_vm2, %v395_v17  ;;  %474 = vst.msk [vmem:[%s280_s8] sm:$0xff] %vm383_vm2, %v395_v17 }
 0x218   : > { %v398_v19 = vsub.f32 %v387_v9, %v397_v18 }
 0x21a   : > { %475 = vst.msk [vmem:[%s1166_s9] sm:$0xff] %vm383_vm2, %v398_v19 }
 0x21b   : > { %813 = shalt.err (!%p810_p5)
}
 0x21c   : > { %s814_s21 = scalar_lea.hbm %s513_s14, 128  ;;  %s818_s13 = scalar_lea.hbm %s1162_s4, 256 }
 0x21d   : > { %p815_p6 = scmp.ne.s32.totalorder %s513_s14, %s814_s21  ;;  %p819_p10 = scmp.lt.s32.totalorder %s513_s14, %s1162_s4 }
 0x21e   : > { %p820_p11 = scmp.lt.s32.totalorder %s818_s13, %s814_s21 }
 0x21f   : > { %p816_p7 = pnand %p815_p6, %p1011_p4 }
 0x220   : > { %p821_p12 = por %p820_p11, %p819_p10 }
 0x221   : > { %p817_p9 = pneg %p816_p7 }
 0x223   : > { %p822_p13 = pnand %p821_p12, %p817_p9 }
 0x225   : > { %825 = shalt.err (!%p822_p13)
}
 0x226   : > { %728 = dma.vmem_to_hbm [thread:$0]  (%p1011_p4), %s516_s15, 128, %s513_s14, %s482_s16  }
 0x227   : > { %s527_s27 = scalar_lea.hbm %s1163_s5, %s1062_s11  ;;  %s1169_s24 = scalar_lea.vmem [#allocation6], %s1048_s7 }
 0x228   : > { %s529_s8 = sshll.u32 %s1169_s24, 4  ;;  %s937_s9 = smov [#allocation6]   ;;  %s530_s8 = int_to_ptr.vmem [resolvable:$true] %s529_s8 }
 0x229   : > { %s826_s29 = scalar_lea.vmem %s530_s8, 128  ;;  %s830_s21 = sshll.u32 %s937_s9, 4  ;;  %s831_s21 = int_to_ptr.vmem [resolvable:$false] %s830_s21 }
 0x22a   : > { %p827_p0 = scmp.ne.s32.totalorder %s530_s8, %s826_s29  ;;  %s832_s12 = scalar_lea.vmem %s831_s21, 256 }
 0x22b   : > { %p833_p3 = scmp.lt.s32.totalorder %s530_s8, %s831_s21  ;;  %p834_p5 = scmp.lt.s32.totalorder %s832_s12, %s826_s29 }
 0x22c   : > { %p828_p1 = pnand %p827_p0, %p1011_p4 }
 0x22d   : > { %p835_p6 = por %p834_p5, %p833_p3 }
 0x22e   : > { %p829_p2 = pneg %p828_p1 }
 0x230   : > { %p836_p7 = pnand %p835_p6, %p829_p2 }
 0x232   : > { %839 = shalt.err (!%p836_p7)
}
 0x233   : > { %s840_s14 = scalar_lea.hbm %s527_s27, 128  ;;  %s844_s25 = scalar_lea.hbm %s1163_s5, 256 }
 0x234   : > { %p841_p9 = scmp.ne.s32.totalorder %s527_s27, %s840_s14  ;;  %p845_p12 = scmp.lt.s32.totalorder %s527_s27, %s1163_s5 }
 0x235   : > { %p846_p13 = scmp.lt.s32.totalorder %s844_s25, %s840_s14 }
 0x236   : > { %p842_p10 = pnand %p841_p9, %p1011_p4 }
 0x237   : > { %p847_p0 = por %p846_p13, %p845_p12 }
 0x238   : > { %p843_p11 = pneg %p842_p10 }
 0x23a   : > { %p848_p1 = pnand %p847_p0, %p843_p11 }
 0x23c   : > { %851 = shalt.err (!%p848_p1)
}
 0x23d   : > { %729 = dma.vmem_to_hbm [thread:$0]  (%p1011_p4), %s530_s8, 128, %s527_s27, %s482_s16   ;;  %vm472_vm3 = vcmask 261120  }
 0x23e   : > { %s273_s29 = scalar_lea.vmem [#allocation2], %s1048_s7  ;;  %s1108_s15 = scalar_lea.hbm %s1161_s3, %s1062_s11 }
 0x23f   : > { %s501_s9 = sshll.u32 %s273_s29, 4  ;;  %s1170_s10 = sand.u32 1, %s916_s19   ;;  %s1110_s9 = int_to_ptr.vmem [resolvable:$true] %s501_s9 }
 0x240   : > { %s477_s14 = scalar_lea.sflag [#allocation3], %s1170_s10  ;;  %s852_s13 = scalar_lea.vmem %s1110_s9, 128 }
 0x241   : > { %p853_p2 = scmp.ne.s32.totalorder %s1110_s9, %s852_s13  ;;  %s938_s7 = smov [#allocation2]  }
 0x242   : > { %s856_s16 = sshll.u32 %s938_s7, 4  ;;  %s857_s16 = int_to_ptr.vmem [resolvable:$false] %s856_s16 }
 0x243   : > { %p854_p3 = pnand %p853_p2, %p1011_p4  ;;  %s858_s11 = scalar_lea.vmem %s857_s16, 256 }
 0x244   : > { %p859_p6 = scmp.lt.s32.totalorder %s1110_s9, %s857_s16  ;;  %p860_p7 = scmp.lt.s32.totalorder %s858_s11, %s852_s13 }
 0x245   : > { %p855_p5 = pneg %p854_p3 }
 0x246   : > { %p861_p9 = por %p860_p7, %p859_p6 }
 0x248   : > { %p862_p10 = pnand %p861_p9, %p855_p5 }
 0x2d7   : > { %v468_v20 = vpop.f32.mrf.mxu1 }
 0x2d8   : > { %473 = vst.msk [vmem:[%s273_s29] sm:$0xff] %vm472_vm3, %v468_v20 }
 0x2d9   : > { %v726_v21 = vpop.f32.mrf.mxu1 }
 0x2da   : > { %865 = shalt.err (!%p862_p10)
}
 0x2db   : > { %s866_s27 = scalar_lea.hbm %s1108_s15, 128  ;;  %s870_s17 = scalar_lea.hbm %s1161_s3, 256 }
 0x2dc   : > { %p867_p11 = scmp.ne.s32.totalorder %s1108_s15, %s866_s27  ;;  %p871_p0 = scmp.lt.s32.totalorder %s1108_s15, %s1161_s3 }
 0x2dd   : > { %p872_p1 = scmp.lt.s32.totalorder %s870_s17, %s866_s27 }
 0x2de   : > { %p868_p12 = pnand %p867_p11, %p1011_p4 }
 0x2df   : > { %p873_p2 = por %p872_p1, %p871_p0 }
 0x2e0   : > { %p869_p13 = pneg %p868_p12 }
 0x2e2   : > { %p874_p3 = pnand %p873_p2, %p869_p13 }
 0x2e4   : > { %877 = shalt.err (!%p874_p3)
}
 0x2e5   : > { %727 = dma.vmem_to_hbm [thread:$0]  (%p1011_p4), %s1110_s9, 128, %s1108_s15, %s477_s14  }
 0x2e6 PF: > { %p743_p5 = scmp.ge.s32.totalorder %s932_s23, 2  ;;  %s541_s21 = sand.u32 1, %s912_s18  }
 0x2e7   : > { %s542_s12 = scalar_lea.sflag [#allocation3], %s541_s21 }
 0x2e8   : > { %p734_p6 = pnand %p743_p5, %p1020_p8 }
 0x2ea   : > { %p735_p7 = pneg %p734_p6 }
 0x2ec   : > { %903 = dma.done.wait (%p735_p7), %s542_s12, 128  }
 0x2ed   : > { %905 = vsyncadd (%p735_p7), %s542_s12, 4294967168  ;;  %s1171_s10 = sadd.s32 4294967294, %s932_s23  }
 0x2ee   : > { %s550_s13 = sand.u32 1, %s1171_s10  }
 0x2ef   : > { %s551_s7 = scalar_lea.sflag [#allocation5], %s550_s13 }
 0x2f0   : > { %907 = dma.done.wait (%p735_p7), %s551_s7, 256  }
 0x2f1   : > { %909 = vsyncadd (%p735_p7), %s551_s7, 4294967040  ;;  %s22_s23 = sadd.s32 1, %s932_s23   ;;  %s1172_s18 = smov %s916_s19 }
 0x2f2   : > { %p19_p4 = scmp.ge.s32.totalorder %s22_s23, 4   ;;  %s1173_s19 = smov %s920_s20 }
 0x2f3   : > { %s1174_s20 = smov %s1026_s6  ;;  %s1175_s21 = smov %s928_s22 }
 0x2f4   : > { %s1176_s22 = smov %s1178_s26  ;;  %21 = sbr.rel (!%p19_p4) target bundleno = 6 (0x6), region = 105 }
 0x2f9   :  { %565 = vsyncpa [#allocation3], 1 }
 0x2fa   :  { %567 = vsyncpa [#allocation3 + $0x1], 1 }
 0x2fb   :  { %568 = vsyncpa [#allocation5], 1 }
 0x2fc   :  { %570 = vsyncpa [#allocation5 + $0x1], 1 }

</bundles_post_ra>
